<compile_context>
chip_gen: v7x
topology: tpu7x:2x2x1
jax: 0.10.0
libtpu: 0.0.40
codegen_flags: <defaults>
</compile_context>

<pallas_src>
import numpy as np
import jax
import jax.numpy as jnp
from jax.experimental import pallas as pl
from jax.experimental.pallas import tpu as pltpu

BIN_SIZES = (1, 2, 3, 6)
NBRANCH = 1 + len(BIN_SIZES)      # identity + 4 pyramid branches


# ---------------------------------------------------------------------------
# Deterministic construction of the fused pool+upsample operator matrix
# ---------------------------------------------------------------------------
def _adaptive_pool_matrix(out_size: int, in_size: int) -> np.ndarray:
    """Row-stochastic matrix implementing 1D AdaptiveAvgPool (PyTorch rule)."""
    P = np.zeros((out_size, in_size), np.float64)
    for i in range(out_size):
        start = (i * in_size) // out_size
        end = -(-((i + 1) * in_size) // out_size)      # ceil division
        P[i, start:end] = 1.0 / (end - start)
    return P


def _bilinear_upsample_matrix(out_size: int, in_size: int) -> np.ndarray:
    """1D bilinear interpolation matrix, align_corners=False (PyTorch rule)."""
    U = np.zeros((out_size, in_size), np.float64)
    scale = in_size / out_size
    for j in range(out_size):
        src = scale * (j + 0.5) - 0.5
        if src < 0.0:
            src = 0.0
        i0 = int(np.floor(src))
        lam = src - i0
        i0 = min(i0, in_size - 1)
        i1 = min(i0 + 1, in_size - 1)
        U[j, i0] += 1.0 - lam
        U[j, i1] += lam
    return U


def _fused_operator(H: int, W: int, dtype) -> jax.Array:
    """Gcat (HW, 4*HW): vec(X) @ Gcat[:, b*HW:(b+1)*HW] == vec(A_b X Bt_b)."""
    blocks = []
    for b in BIN_SIZES:
        A = _bilinear_upsample_matrix(H, b) @ _adaptive_pool_matrix(b, H)       # (H, H)
        Bt = (_bilinear_upsample_matrix(W, b) @ _adaptive_pool_matrix(b, W)).T  # (W, W)
        blocks.append(np.kron(A.T, Bt))                                         # (HW, HW)
    return jnp.asarray(np.concatenate(blocks, axis=1), dtype=dtype)             # (HW, 4HW)


# ---------------------------------------------------------------------------
# Channel-tile selection
# ---------------------------------------------------------------------------
def _pick_tm(C: int, HW: int, itemsize: int) -> int:
    """Largest channel block that keeps double-buffered x/out tiles small.

    Valid tiles are multiples of 8 that divide C (sublane alignment) or C
    itself (full-dim block).  Biggest tile that fits wins (amortizes the
    ~0.35 us per-grid-step overhead)."""
    budget = 8 * 2**20                       # x + out, double-buffered

    def fits(tm):
        return 2 * (1 + NBRANCH) * tm * HW * itemsize <= budget

    if fits(C):
        return C                             # whole channel dim in one block
    cands = [d for d in range(512, 7, -1) if C % d == 0 and d % 8 == 0 and fits(d)]
    return cands[0] if cands else C          # TODO(synk): pad C for pathological C


# ---------------------------------------------------------------------------
# Pallas kernel + wrapper
# ---------------------------------------------------------------------------
def pyramid_pooling(x: jax.Array) -> jax.Array:
    """x: (N, C, H, W) -> (N, 5*C, H, W), same dtype as x."""
    N, C, H, W = x.shape
    HW = H * W
    dtype = x.dtype
    itemsize = jnp.dtype(dtype).itemsize
    nbins = len(BIN_SIZES)

    Gcat = _fused_operator(H, W, dtype)               # (HW, 4*HW), VMEM resident
    xs = x.reshape(N, C, HW)                          # free contiguous reshape
    TM = _pick_tm(C, HW, itemsize)

    def kernel(x_ref, g_ref, o_ref):
        # x_ref: (1, TM, HW)      TM channel slices, spatial dims flattened
        # g_ref: (HW, 4*HW)       fused pool+upsample operators (resident)
        # o_ref: (1, 5, TM, HW)   identity branch + 4 pyramid branches
        xv = x_ref[0]
        o_ref[0, 0] = xv                              # identity branch
        # one MXU matmul covers all four pyramid branches
        y = jnp.dot(xv, g_ref[...], preferred_element_type=jnp.float32)
        y = y.astype(o_ref.dtype)
        for b in range(nbins):                        # lane-aligned slices (HW % 128 == 0)
            o_ref[0, b + 1] = y[:, b * HW:(b + 1) * HW]

    out = pl.pallas_call(
        kernel,
        out_shape=jax.ShapeDtypeStruct((N, NBRANCH, C, HW), dtype),
        grid=(N, C // TM),
        in_specs=[
            pl.BlockSpec((1, TM, HW), lambda n, cb: (n, cb, 0)),
            pl.BlockSpec((HW, nbins * HW), lambda n, cb: (0, 0)),
        ],
        out_specs=pl.BlockSpec((1, NBRANCH, TM, HW), lambda n, cb: (n, 0, cb, 0)),
        compiler_params=pltpu.CompilerParams(
            dimension_semantics=("parallel", "parallel")),
    )(xs, Gcat)

    # (N, 5, C, HW) -> (N, 5*C, H, W): contiguous merge/split, no data movement.
    return out.reshape(N, NBRANCH * C, H, W)


# ---------------------------------------------------------------------------
# Independent reference: direct adaptive pooling + bilinear interpolation
# (matrix-free, follows the PyTorch index formulas explicitly)
# ---------------------------------------------------------------------------
def _adaptive_avg_pool2d_ref(x: jax.Array, bin_size: int) -> jax.Array:
    N, C, H, W = x.shape
    rows = []
    for i in range(bin_size):
        h0 = (i * H) // bin_size
        h1 = -(-((i + 1) * H) // bin_size)
        cols = []
        for j in range(bin_size):
            w0 = (j * W) // bin_size
            w1 = -(-((j + 1) * W) // bin_size)
            cols.append(jnp.mean(x[:, :, h0:h1, w0:w1], axis=(2, 3)))
        rows.append(jnp.stack(cols, axis=-1))
    return jnp.stack(rows, axis=-2)                   # (N, C, bin, bin)


def _bilinear_upsample_ref(x: jax.Array, out_h: int, out_w: int) -> jax.Array:
    # mode='bilinear', align_corners=False
    _, _, h, w = x.shape

    def src(out_size, in_size):
        scale = in_size / out_size
        s = np.maximum(scale * (np.arange(out_size) + 0.5) - 0.5, 0.0)
        i0 = np.floor(s).astype(np.int32)
        lam = (s - i0).astype(np.float32)
        i0 = np.minimum(i0, in_size - 1)
        i1 = np.minimum(i0 + 1, in_size - 1)
        return i0, i1, lam

    y0, y1, ly = src(out_h, h)
    x0, x1, lx = src(out_w, w)
    ly = jnp.asarray(ly)[None, None, :, None]
    lx = jnp.asarray(lx)[None, None, None, :]

    def gather(yi, xi):
        return x[:, :, yi, :][:, :, :, xi]

    top = gather(y0, x0) * (1.0 - lx) + gather(y0, x1) * lx
    bot = gather(y1, x0) * (1.0 - lx) + gather(y1, x1) * lx
    return top * (1.0 - ly) + bot * ly


def pyramid_pooling_ref(x: jax.Array) -> jax.Array:
    _, _, H, W = x.shape
    feats = [x]
    for b in BIN_SIZES:
        feats.append(_bilinear_upsample_ref(_adaptive_avg_pool2d_ref(x, b), H, W))
    return jnp.concatenate(feats, axis=1)


if __name__ == "__main__":
    key = jax.random.PRNGKey(0)
    N, C, H, W = 2, 4, 16, 16
    x = jax.random.normal(key, (N, C, H, W), dtype=jnp.float32)

    out = jax.block_until_ready(pyramid_pooling(x))
    ref = jax.block_until_ready(pyramid_pooling_ref(x))

    assert out.shape == (N, NBRANCH * C, H, W), out.shape
    assert out.dtype == x.dtype, out.dtype
    err = float(jnp.max(jnp.abs(out.astype(jnp.float32) - ref.astype(jnp.float32))))
    # tolerance covers MXU f32 multi-pass decomposition; real bugs are O(0.1+)
    assert err < 2e-3, f"max abs err {err} vs direct pool+interpolate reference"
    print("KERNEL_OK")
</pallas_src>

<mosaic_0001>
module attributes {stable_mosaic.version = 11 : i64} {
  func.func @kernel(%arg0: i32, %arg1: i32, %arg2: memref<1x4x256xf32, #tpu.memory_space<vmem>>, %arg3: memref<256x1024xf32, #tpu.memory_space<vmem>>, %arg4: memref<1x5x4x256xf32, #tpu.memory_space<vmem>>) attributes {dimension_semantics = [#tpu.dimension_semantics<parallel>, #tpu.dimension_semantics<parallel>], iteration_bounds = array<i64: 2, 1>, scalar_prefetch = 0 : i64, scratch_operands = 0 : i64, tpu.core_type = #tpu.core_type<tc>, window_params = [{transform_indices = @transform_0, window_bounds = array<i64: 1, 4, 256>}, {pipeline_mode = #tpu.pipeline_mode<synchronous>, transform_indices = @transform_1, window_bounds = array<i64: 256, 1024>}, {transform_indices = @transform_2, window_bounds = array<i64: 1, 5, 4, 256>}]} {
    %c0 = arith.constant 0 : index
    %c0_0 = arith.constant 0 : index
    %c0_1 = arith.constant 0 : index
    %0 = vector.load %arg2[%c0, %c0_0, %c0_1] : memref<1x4x256xf32, #tpu.memory_space<vmem>>, vector<1x4x256xf32>
    %1 = vector.shape_cast %0 : vector<1x4x256xf32> to vector<4x256xf32>
    %c0_2 = arith.constant 0 : index
    %c0_3 = arith.constant 0 : index
    %c0_4 = arith.constant 0 : index
    %c0_5 = arith.constant 0 : index
    %2 = vector.load %arg4[%c0_2, %c0_3, %c0_4, %c0_5] : memref<1x5x4x256xf32, #tpu.memory_space<vmem>>, vector<1x1x4x256xf32>
    %3 = vector.shape_cast %2 : vector<1x1x4x256xf32> to vector<4x256xf32>
    %4 = vector.shape_cast %1 : vector<4x256xf32> to vector<1x1x4x256xf32>
    tpu.vector_store %arg4[%c0_2, %c0_3, %c0_4, %c0_5], %4 {strides = array<i32>} : memref<1x5x4x256xf32, #tpu.memory_space<vmem>>, vector<1x1x4x256xf32>,
    %c0_6 = arith.constant 0 : index
    %c0_7 = arith.constant 0 : index
    %5 = vector.load %arg3[%c0_6, %c0_7] : memref<256x1024xf32, #tpu.memory_space<vmem>>, vector<256x1024xf32>
    %cst = arith.constant dense<0.000000e+00> : vector<4x1024xf32>
    %6 = tpu.matmul %1, %5, %cst {dimension_numbers = #tpu.dot_dimension_numbers<[1], [0], [0], [1], [0, 0, 1, 1], [], []>} : vector<4x256xf32>, vector<256x1024xf32>, vector<4x1024xf32> -> vector<4x1024xf32>
    %7 = vector.extract_strided_slice %6 {offsets = [0, 0], sizes = [4, 256], strides = [1, 1]} : vector<4x1024xf32> to vector<4x256xf32>
    %c0_8 = arith.constant 0 : index
    %c1 = arith.constant 1 : index
    %c0_9 = arith.constant 0 : index
    %c0_10 = arith.constant 0 : index
    %8 = vector.load %arg4[%c0_8, %c1, %c0_9, %c0_10] : memref<1x5x4x256xf32, #tpu.memory_space<vmem>>, vector<1x1x4x256xf32>
    %9 = vector.shape_cast %8 : vector<1x1x4x256xf32> to vector<4x256xf32>
    %10 = vector.shape_cast %7 : vector<4x256xf32> to vector<1x1x4x256xf32>
    tpu.vector_store %arg4[%c0_8, %c1, %c0_9, %c0_10], %10 {strides = array<i32>} : memref<1x5x4x256xf32, #tpu.memory_space<vmem>>, vector<1x1x4x256xf32>,
    %11 = vector.extract_strided_slice %6 {offsets = [0, 256], sizes = [4, 256], strides = [1, 1]} : vector<4x1024xf32> to vector<4x256xf32>
    %c0_11 = arith.constant 0 : index
    %c2 = arith.constant 2 : index
    %c0_12 = arith.constant 0 : index
    %c0_13 = arith.constant 0 : index
    %12 = vector.load %arg4[%c0_11, %c2, %c0_12, %c0_13] : memref<1x5x4x256xf32, #tpu.memory_space<vmem>>, vector<1x1x4x256xf32>
    %13 = vector.shape_cast %12 : vector<1x1x4x256xf32> to vector<4x256xf32>
    %14 = vector.shape_cast %11 : vector<4x256xf32> to vector<1x1x4x256xf32>
    tpu.vector_store %arg4[%c0_11, %c2, %c0_12, %c0_13], %14 {strides = array<i32>} : memref<1x5x4x256xf32, #tpu.memory_space<vmem>>, vector<1x1x4x256xf32>,
    %15 = vector.extract_strided_slice %6 {offsets = [0, 512], sizes = [4, 256], strides = [1, 1]} : vector<4x1024xf32> to vector<4x256xf32>
    %c0_14 = arith.constant 0 : index
    %c3 = arith.constant 3 : index
    %c0_15 = arith.constant 0 : index
    %c0_16 = arith.constant 0 : index
    %16 = vector.load %arg4[%c0_14, %c3, %c0_15, %c0_16] : memref<1x5x4x256xf32, #tpu.memory_space<vmem>>, vector<1x1x4x256xf32>
    %17 = vector.shape_cast %16 : vector<1x1x4x256xf32> to vector<4x256xf32>
    %18 = vector.shape_cast %15 : vector<4x256xf32> to vector<1x1x4x256xf32>
    tpu.vector_store %arg4[%c0_14, %c3, %c0_15, %c0_16], %18 {strides = array<i32>} : memref<1x5x4x256xf32, #tpu.memory_space<vmem>>, vector<1x1x4x256xf32>,
    %19 = vector.extract_strided_slice %6 {offsets = [0, 768], sizes = [4, 256], strides = [1, 1]} : vector<4x1024xf32> to vector<4x256xf32>
    %c0_17 = arith.constant 0 : index
    %c4 = arith.constant 4 : index
    %c0_18 = arith.constant 0 : index
    %c0_19 = arith.constant 0 : index
    %20 = vector.load %arg4[%c0_17, %c4, %c0_18, %c0_19] : memref<1x5x4x256xf32, #tpu.memory_space<vmem>>, vector<1x1x4x256xf32>
    %21 = vector.shape_cast %20 : vector<1x1x4x256xf32> to vector<4x256xf32>
    %22 = vector.shape_cast %19 : vector<4x256xf32> to vector<1x1x4x256xf32>
    tpu.vector_store %arg4[%c0_17, %c4, %c0_18, %c0_19], %22 {strides = array<i32>} : memref<1x5x4x256xf32, #tpu.memory_space<vmem>>, vector<1x1x4x256xf32>,
    return
  }
  func.func @transform_0(%arg0: i32, %arg1: i32) -> (i32, i32, i32) {
    %c0_i32 = arith.constant 0 : i32
    %c0_i32_0 = arith.constant 0 : i32
    return %arg0, %arg1, %c0_i32 : i32, i32, i32
  }
  func.func @transform_1(%arg0: i32, %arg1: i32) -> (i32, i32) {
    %c0_i32 = arith.constant 0 : i32
    %c0_i32_0 = arith.constant 0 : i32
    %c0_i32_1 = arith.constant 0 : i32
    return %c0_i32, %c0_i32_0 : i32, i32
  }
  func.func @transform_2(%arg0: i32, %arg1: i32) -> (i32, i32, i32, i32) {
    %c0_i32 = arith.constant 0 : i32
    %c0_i32_0 = arith.constant 0 : i32
    %c0_i32_1 = arith.constant 0 : i32
    return %arg0, %c0_i32, %arg1, %c0_i32_0 : i32, i32, i32, i32
  }
}

</mosaic_0001>

<bundles_post_ra>
// kernel: tpu_custom_call.1
= control target key start
LH: loop header
LB: loop body
LE: loop exit
PB: predicated region body
PF: predicated region fallthrough
CT: control target
= control target key end

     0   :  { %7 = vsyncpa [#allocation3], 0  ;;  %s1633_s0 = inlined_call_operand.hbm [shape: f32[2,4,256], index: 0, kind: input, shape index: {}]   ;;  %s1634_s1 = inlined_call_operand.hbm [shape: f32[256,1024], index: 1, kind: input, shape index: {}]   ;;  %s1635_s2 = inlined_call_operand.hbm [shape: f32[2,5,4,256], index: 2, kind: output, shape index: {}]  }
   0x1   :  { %9 = vsyncpa [#allocation3 + $0x1], 0 }
   0x2   :  { %10 = vsyncpa [#allocation6], 0 }
   0x3   :  { %11 = vsyncpa [#allocation4], 0 }
   0x4   :  { %13 = vsyncpa [#allocation4 + $0x1], 0  ;;  %s1398_s9 = smov 0   ;;  %s1400_s10 = smov 0  }
   0x5   :  { %s1402_s11 = smov 0   ;;  %s1404_s12 = smov 0  }
   0x6   :  { %s1406_s13 = smov 0   ;;  %s1408_s14 = smov 0  }
   0x7 LB: > { %s875_s15 = sadd.s32 4294967295, %s1374_s14   ;;  %s876_s16 = sadd.s32 4294967294, %s1374_s14   ;;  %s1374_s14 = sphi %s1408_s14, %s19_s14   ;;  %s1370_s13 = sphi %s1406_s13, %s1659_s13   ;;  %s1366_s12 = sphi %s1404_s12, %s1658_s12   ;;  %s1362_s11 = sphi %s1402_s11, %s1657_s11   ;;  %s1358_s10 = sphi %s1400_s10, %s1656_s10   ;;  %s1354_s9 = sphi %s1398_s9, %s1655_s9  }
   0x8   : > { %p53_p0 = scmp.ne.s32.totalorder %s1358_s10, %s1354_s9  ;;  %p1432_p1 = scmp.eq.s32.totalorder %s875_s15, 0 }
   0x9   : > { %p1436_p2 = scmp.eq.s32.totalorder %s875_s15, 1  ;;  %p106_p3 = scmp.eq.s32.totalorder %s876_s16, 1 }
   0xa   : > { %s1640_s17 = scalar_select %p1432_p1, 1, 0 }
   0xb   : > { %s1641_s18 = scalar_select %p1436_p2, 1, 0 }
   0xc   : > { %p1442_p4 = por %p1432_p1, %p53_p0  ;;  %p877_p5 = scmp.ge.s32.totalorder %s1374_s14, 1 }
   0xd   : > { %p1447_p6 = por %p106_p3, %p53_p0  ;;  %p113_p7 = scmp.lt.s32.totalorder %s1374_s14, 3 }
   0xe   : > { %s1642_s19 = scalar_select %p1442_p4, 1, 0 }
   0xf   : > { %s1643_s20 = scalar_select %p1447_p6, 1, 0 }
  0x10   : > { %p1452_p8 = pnand %p877_p5, %p113_p7  ;;  %s1376_s22 = smov [#allocation5]  }
  0x11   : > { %s125_s23 = sshll.u32 %s1376_s22, 4  ;;  %s31_s25 = sadd.s32 1, %s1370_s13  ;;  %s126_s23 = int_to_ptr.vmem [resolvable:$true] %s125_s23 }
  0x12   : > { %s1644_s21 = scalar_select %p1452_p8, 1, 0 }
  0x13   : > { %p1160_p9 = pneg %p1452_p8  ;;  %s1230_s28 = scalar_lea.hbm %s1634_s1, 32768 }
  0x14   : > { %p1231_p12 = scmp.ne.s32.totalorder %s1634_s1, %s1230_s28  ;;  %p1237_p5 = scmp.lt.u32.totalorder %s1230_s28, %s1634_s1 }
  0x15   : > { %p1461_p11 = pnand %p1160_p9, %p1432_p1 }
  0x17   : > { %p1232_p13 = pneg %p1461_p11 }
  0x19   : > { %p1233_p0 = pnand %p1232_p13, %p1231_p12 }
  0x1b   : > { %p1234_p3 = pneg %p1233_p0 }
  0x1d   : > { %p1239_p7 = pnand %p1237_p5, %p1234_p3 }
  0x1f   : > { %1242 = shalt.err (!%p1239_p7)
}
  0x20   : > { %s1243_s5 = scalar_lea.vmem %s126_s23, 32768  ;;  %p1251_p1 = scmp.lt.s32.totalorder %s126_s23, %s126_s23 }
  0x21   : > { %p1244_p9 = scmp.ne.s32.totalorder %s126_s23, %s1243_s5  ;;  %p1252_p4 = scmp.lt.s32.totalorder %s1243_s5, %s1243_s5 }
  0x23   : > { %p1246_p10 = pnand %p1244_p9, %p1232_p13  ;;  %p1253_p8 = por %p1252_p4, %p1251_p1 }
  0x25   : > { %p1247_p6 = pneg %p1246_p10 }
  0x27   : > { %p1254_p2 = pnand %p1253_p8, %p1247_p6 }
  0x29   : > { %1257 = shalt.err (!%p1254_p2)
}
  0x2a   : > { %s1377_s6 = smov 1024   ;;  %s1378_s7 = smov 64  }
  0x2b   : > { %1163 = dma.hbm_to_vmem [thread:$0]  (!%p1461_p11), %s1634_s1, 32768, %s126_s23, [#allocation6], %s1377_s6, %s1377_s6, %s1378_s7  }
  0x2c   : > { %p33_p1 = scmp.ge.s32.totalorder %s31_s25, 2  ;;  %s40_s16 = sadd.s32 1, %s1362_s11 }
  0x2d   : > { %p47_p2 = scmp.ne.s32.totalorder %s1362_s11, %s1358_s10  ;;  %p48_p4 = scmp.eq.s32.totalorder %s1374_s14, 0 }
  0x2e   : > { %s1661_s25 = smov (%p33_p1, %s31_s25), 0  ;;  %p1647_p8 = scmp.ne.s32.totalorder %s1641_s18, 0 }
  0x2f   : > { %p1488_p6 = por %p48_p4, %p47_p2  ;;  %s35_s24 = ssub.s32 %s1370_s13, %s1661_s25 }
  0x30   : > { %p1494_p10 = por %p1647_p8, %p47_p2  ;;  %p1173_p12 = scmp.lt.s32.totalorder %s1374_s14, 2 }
  0x31   : > { %p38_p11 = scmp.eq.s32.totalorder %s35_s24, 0  ;;  %s139_s23 = sand.u32 1, %s1362_s11  }
  0x32   : > { %s880_s27 = sshll.u32 %s139_s23, 3  ;;  %s893_s29 = sshll.u32 %s1370_s13, 7 }
  0x33   : > { %s1503_s28 = scalar_select %p38_p11, %s1362_s11, %s40_s16  }
  0x34   : > { %s1509_s4 = scalar_lea.hbm %s1633_s0, %s893_s29  ;;  %s143_s18 = scalar_lea.vmem [#allocation2], %s880_s27 }
  0x35   : > { %s153_s5 = sshll.u32 %s143_s18, 4  ;;  %p1515_p13 = pnand %p1173_p12, %p1488_p6  ;;  %s1511_s5 = int_to_ptr.vmem [resolvable:$true] %s153_s5 }
  0x36   : > { %s140_s7 = scalar_lea.sflag [#allocation3], %s139_s23  ;;  %s1258_s8 = scalar_lea.hbm %s1509_s4, 128 }
  0x37   : > { %p1259_p0 = scmp.ne.s32.totalorder %s1509_s4, %s1258_s8  ;;  %p1260_p3 = pneg %p1515_p13 }
  0x38   : > { %s1263_s24 = scalar_lea.hbm %s1633_s0, 256  ;;  %p1264_p9 = scmp.lt.u32.totalorder %s1509_s4, %s1633_s0 }
  0x39   : > { %p1261_p5 = pnand %p1260_p3, %p1259_p0  ;;  %p1265_p1 = scmp.lt.u32.totalorder %s1263_s24, %s1258_s8 }
  0x3a   : > { %p1267_p4 = scmp.lt.u32.totalorder %s1258_s8, %s1509_s4 }
  0x3b   : > { %p1262_p7 = pneg %p1261_p5  ;;  %p1266_p2 = por %p1265_p1, %p1264_p9 }
  0x3d   : > { %p1268_p6 = por %p1267_p4, %p1266_p2 }
  0x3f   : > { %p1269_p8 = pnand %p1268_p6, %p1262_p7 }
  0x41   : > { %1272 = shalt.err (!%p1269_p8)
}
  0x42   : > { %s1273_s23 = scalar_lea.vmem %s1511_s5, 128  ;;  %s1379_s29 = smov [#allocation2]  }
  0x43   : > { %p1274_p12 = scmp.ne.s32.totalorder %s1511_s5, %s1273_s23  ;;  %s1278_s30 = sshll.u32 %s1379_s29, 4  ;;  %s1279_s30 = int_to_ptr.vmem [resolvable:$false] %s1278_s30 }
  0x44   : > { %s1280_s3 = scalar_lea.vmem %s1279_s30, 256  ;;  %p1281_p5 = scmp.lt.s32.totalorder %s1511_s5, %s1279_s30 }
  0x45   : > { %p1276_p11 = pnand %p1274_p12, %p1260_p3  ;;  %p1282_p9 = scmp.lt.s32.totalorder %s1280_s3, %s1273_s23 }
  0x47   : > { %p1277_p0 = pneg %p1276_p11  ;;  %p1283_p1 = por %p1282_p9, %p1281_p5 }
  0x49   : > { %p1284_p2 = pnand %p1283_p1, %p1277_p0 }
  0x4b   : > { %1287 = shalt.err (!%p1284_p2)
}
  0x4c   : > { %1167 = dma.hbm_to_vmem [thread:$0]  (!%p1515_p13), %s1509_s4, 128, %s1511_s5, %s140_s7  }
  0x4d   : > { %p1650_p7 = scmp.ne.s32.totalorder %s1644_s21, 0 }
  0x4e   : > { %s1547_s18 = sand.u32 (!%p1650_p7), 1, %s1358_s10   ;;  %p1651_p3 = scmp.ne.s32.totalorder (!%p1650_p7), %s1642_s19, 0 }
  0x4f   : > { %162 = sbr.rel (%p1650_p7) target bundleno = 453 (0x1c5), region = 28  ;;  %s884_s8 = sshll.u32 (!%p1650_p7), %s1547_s18, 3 }
  0x50   : > { %s165_s15 = scalar_lea.sflag (!%p1650_p7), [#allocation3], %s1547_s18  ;;  %s1551_s16 = scalar_lea.vmem (!%p1650_p7), [#allocation2], %s884_s8 }
  0x56   : > { %1341 = dma.done.wait (%p1651_p3), %s165_s15, 128  }
  0x57   : > { %1343 = vsyncadd (%p1651_p3), %s165_s15, 4294967168  ;;  %p1652_p13 = scmp.ne.s32.totalorder %s1640_s17, 0 }
  0x59   : > { %1345 = dma.done.wait (%p1652_p13), [#allocation6], 32768  }
  0x5a   : > { %1347 = vsyncadd (%p1652_p13), [#allocation6], 4294934528  ;;  %v196_v0 = vld [vmem:[#allocation5 + $0x8] sm:$0xff]  ;;  %v198_v2 = vld [vmem:[#allocation5 + $0x18] sm:$0xff]  ;;  %s1150_s17 = smul.u32 40, %s1547_s18  ;;  %s763_s24 = scalar_lea.sflag [#allocation4], %s1547_s18 }
  0x5b   : > { %v204_v1 = vld [vmem:[#allocation5 + $0x48] sm:$0xff]  ;;  %v206_v4 = vld [vmem:[#allocation5 + $0x58] sm:$0xff]  ;;  %v195_v5 = vld [vmem:[#allocation5] sm:$0xff]  ;;  %s1151_s4 = smul.u32 640, %s1366_s12  ;;  %s1380_s22 = smov [#allocation7]  }
  0x5c   : > { %v894_v3 = vpack.c.bf16 %v204_v1, %v196_v0  ;;  %v203_v6 = vld [vmem:[#allocation5 + $0x40] sm:$0xff]  ;;  %v958_v7 = vpack.c.bf16 %v206_v4, %v198_v2  ;;  %v197_v9 = vld [vmem:[#allocation5 + $0x10] sm:$0xff]  ;;  %v212_v11 = vld [vmem:[#allocation5 + $0x88] sm:$0xff]  ;;  %s192_s19 = scalar_lea.vmem [#allocation7], %s1150_s17  ;;  %s1292_s27 = sshll.u32 %s1380_s22, 4  ;;  %s1293_s27 = int_to_ptr.vmem [resolvable:$false] %s1292_s27 }
  0x5d   : > { %v896_v8 = vpack.c.bf16 %v203_v6, %v195_v5  ;;  %v205_v10 = vld [vmem:[#allocation5 + $0x50] sm:$0xff]  ;;  %v220_v13 = vld [vmem:[#allocation5 + $0xc8] sm:$0xff]  ;;  %v214_v14 = vld [vmem:[#allocation5 + $0x98] sm:$0xff]  ;;  %s778_s21 = sshll.u32 %s192_s19, 4  ;;  %s1584_s7 = scalar_lea.hbm %s1635_s2, %s1151_s4  ;;  %s1579_s21 = int_to_ptr.vmem [resolvable:$true] %s778_s21 }
  0x5e   : > { %895 = vmatprep.subr.bf16.mxu0 %v894_v3  ;;  %v960_v12 = vpack.c.bf16 %v205_v10, %v197_v9  ;;  %v222_v15 = vld [vmem:[#allocation5 + $0xd8] sm:$0xff]  ;;  %959 = vmatprep.subr.bf16.mxu1 %v958_v7  ;;  %v898_v16 = vpack.c.bf16 %v220_v13, %v212_v11  ;;  %v211_v18 = vld [vmem:[#allocation5 + $0x80] sm:$0xff]  ;;  %v213_v20 = vld [vmem:[#allocation5 + $0x90] sm:$0xff]  ;;  %s1288_s12 = scalar_lea.vmem %s1579_s21, 640  ;;  %s1294_s23 = scalar_lea.vmem %s1293_s27, 1280 }
  0x5f   : > { %897 = vmatpush1.bf16.msra.mxu0 %v896_v8  ;;  %v962_v17 = vpack.c.bf16 %v222_v15, %v214_v14  ;;  %v219_v19 = vld [vmem:[#allocation5 + $0xc0] sm:$0xff]  ;;  %v221_v22 = vld [vmem:[#allocation5 + $0xd0] sm:$0xff]  ;;  %v228_v23 = vld [vmem:[#allocation5 + $0x108] sm:$0xff]  ;;  %p1289_p4 = scmp.ne.s32.totalorder %s1579_s21, %s1288_s12  ;;  %p1295_p12 = scmp.lt.s32.totalorder %s1579_s21, %s1293_s27 }
  0x60   : > { %961 = vmatpush1.bf16.msra.mxu1 %v960_v12  ;;  %v900_v21 = vpack.c.bf16 %v219_v19, %v211_v18  ;;  %v236_v24 = vld [vmem:[#allocation5 + $0x148] sm:$0xff]  ;;  %899 = vmatprep.subr.bf16.mxu0 %v898_v16  ;;  %v964_v25 = vpack.c.bf16 %v221_v22, %v213_v20  ;;  %v230_v27 = vld [vmem:[#allocation5 + $0x118] sm:$0xff]  ;;  %v227_v29 = vld [vmem:[#allocation5 + $0x100] sm:$0xff]  ;;  %p1296_p11 = scmp.lt.s32.totalorder %s1294_s23, %s1288_s12 }
  0x61   : > { %963 = vmatprep.subr.bf16.mxu1 %v962_v17  ;;  %v902_v26 = vpack.c.bf16 %v236_v24, %v228_v23  ;;  %v238_v28 = vld [vmem:[#allocation5 + $0x158] sm:$0xff]  ;;  %v235_v31 = vld [vmem:[#allocation5 + $0x140] sm:$0xff]  ;;  %v229_v32 = vld [vmem:[#allocation5 + $0x110] sm:$0xff]  ;;  %p1290_p6 = pnand %p1289_p4, %p1494_p10 }
  0x62   : > { %v966_v30 = vpack.c.bf16 %v238_v28, %v230_v27  ;;  %v237_v33 = vld [vmem:[#allocation5 + $0x150] sm:$0xff]  ;;  %v904_v34 = vpack.c.bf16 %v235_v31, %v227_v29  ;;  %v244_v35 = vld [vmem:[#allocation5 + $0x188] sm:$0xff]  ;;  %v246_v37 = vld [vmem:[#allocation5 + $0x198] sm:$0xff]  ;;  %p1297_p0 = por %p1296_p11, %p1295_p12 }
  0x63   : > { %901 = vmatpush1.bf16.msra.mxu0 %v900_v21  ;;  %v252_v36 = vld [vmem:[#allocation5 + $0x1c8] sm:$0xff]  ;;  %v968_v38 = vpack.c.bf16 %v237_v33, %v229_v32  ;;  %v254_v40 = vld [vmem:[#allocation5 + $0x1d8] sm:$0xff]  ;;  %v243_v41 = vld [vmem:[#allocation5 + $0x180] sm:$0xff]  ;;  %p1291_p8 = pneg %p1290_p6 }
  0x64   : > { %965 = vmatpush1.bf16.msra.mxu1 %v964_v25  ;;  %903 = vmatprep.subr.bf16.mxu0 %v902_v26  ;;  %v906_v39 = vpack.c.bf16 %v252_v36, %v244_v35  ;;  %v251_v42 = vld [vmem:[#allocation5 + $0x1c0] sm:$0xff]  ;;  %v970_v43 = vpack.c.bf16 %v254_v40, %v246_v37  ;;  %v245_v44 = vld [vmem:[#allocation5 + $0x190] sm:$0xff]  ;;  %v260_v46 = vld [vmem:[#allocation5 + $0x208] sm:$0xff] }
  0x65   : > { %967 = vmatprep.subr.bf16.mxu1 %v966_v30  ;;  %v253_v45 = vld [vmem:[#allocation5 + $0x1d0] sm:$0xff]  ;;  %v268_v47 = vld [vmem:[#allocation5 + $0x248] sm:$0xff]  ;;  %v262_v48 = vld [vmem:[#allocation5 + $0x218] sm:$0xff]  ;;  %v908_v50 = vpack.c.bf16 %v251_v42, %v243_v41  ;;  %p1298_p5 = pnand %p1297_p0, %p1291_p8 }
  0x66   : > { %v270_v49 = vld [vmem:[#allocation5 + $0x258] sm:$0xff]  ;;  %v972_v51 = vpack.c.bf16 %v253_v45, %v245_v44  ;;  %v910_v52 = vpack.c.bf16 %v268_v47, %v260_v46  ;;  %v259_v53 = vld [vmem:[#allocation5 + $0x200] sm:$0xff]  ;;  %v261_v55 = vld [vmem:[#allocation5 + $0x210] sm:$0xff] }
  0x67   : > { %905 = vmatpush1.bf16.msra.mxu0 %v904_v34  ;;  %v267_v54 = vld [vmem:[#allocation5 + $0x240] sm:$0xff]  ;;  %v974_v56 = vpack.c.bf16 %v270_v49, %v262_v48  ;;  %v269_v57 = vld [vmem:[#allocation5 + $0x250] sm:$0xff]  ;;  %v276_v58 = vld [vmem:[#allocation5 + $0x288] sm:$0xff] }
  0x68   : > { %969 = vmatpush1.bf16.msra.mxu1 %v968_v38  ;;  %907 = vmatprep.subr.bf16.mxu0 %v906_v39  ;;  %v284_v59 = vld [vmem:[#allocation5 + $0x2c8] sm:$0xff]  ;;  %v278_v60 = vld [vmem:[#allocation5 + $0x298] sm:$0xff]  ;;  %v912_v62 = vpack.c.bf16 %v267_v54, %v259_v53  ;;  %v976_v63 = vpack.c.bf16 %v269_v57, %v261_v55  ;;  %v275_v1 = vld [vmem:[#allocation5 + $0x280] sm:$0xff] }
  0x69   : > { %971 = vmatprep.subr.bf16.mxu1 %v970_v43  ;;  %v286_v61 = vld [vmem:[#allocation5 + $0x2d8] sm:$0xff]  ;;  %v914_v0 = vpack.c.bf16 %v284_v59, %v276_v58  ;;  %v283_v2 = vld [vmem:[#allocation5 + $0x2c0] sm:$0xff]  ;;  %v277_v3 = vld [vmem:[#allocation5 + $0x290] sm:$0xff] }
  0x6a   : > { %v978_v4 = vpack.c.bf16 %v286_v61, %v278_v60  ;;  %v285_v5 = vld [vmem:[#allocation5 + $0x2d0] sm:$0xff]  ;;  %v292_v6 = vld [vmem:[#allocation5 + $0x308] sm:$0xff]  ;;  %v294_v8 = vld [vmem:[#allocation5 + $0x318] sm:$0xff]  ;;  %v916_v10 = vpack.c.bf16 %v283_v2, %v275_v1 }
  0x6b   : > { %909 = vmatpush1.bf16.msra.mxu0 %v908_v50  ;;  %v300_v7 = vld [vmem:[#allocation5 + $0x348] sm:$0xff]  ;;  %v302_v9 = vld [vmem:[#allocation5 + $0x358] sm:$0xff]  ;;  %v980_v11 = vpack.c.bf16 %v285_v5, %v277_v3  ;;  %v291_v13 = vld [vmem:[#allocation5 + $0x300] sm:$0xff] }
  0x6c   : > { %973 = vmatpush1.bf16.msra.mxu1 %v972_v51  ;;  %911 = vmatprep.subr.bf16.mxu0 %v910_v52  ;;  %v918_v12 = vpack.c.bf16 %v300_v7, %v292_v6  ;;  %v299_v14 = vld [vmem:[#allocation5 + $0x340] sm:$0xff]  ;;  %v293_v15 = vld [vmem:[#allocation5 + $0x310] sm:$0xff]  ;;  %v982_v16 = vpack.c.bf16 %v302_v9, %v294_v8  ;;  %v308_v18 = vld [vmem:[#allocation5 + $0x388] sm:$0xff] }
  0x6d   : > { %975 = vmatprep.subr.bf16.mxu1 %v974_v56  ;;  %v301_v17 = vld [vmem:[#allocation5 + $0x350] sm:$0xff]  ;;  %v316_v19 = vld [vmem:[#allocation5 + $0x3c8] sm:$0xff]  ;;  %v310_v20 = vld [vmem:[#allocation5 + $0x398] sm:$0xff]  ;;  %v920_v22 = vpack.c.bf16 %v299_v14, %v291_v13 }
  0x6e   : > { %v318_v21 = vld [vmem:[#allocation5 + $0x3d8] sm:$0xff]  ;;  %v984_v23 = vpack.c.bf16 %v301_v17, %v293_v15  ;;  %v922_v24 = vpack.c.bf16 %v316_v19, %v308_v18  ;;  %v307_v25 = vld [vmem:[#allocation5 + $0x380] sm:$0xff]  ;;  %v309_v27 = vld [vmem:[#allocation5 + $0x390] sm:$0xff] }
  0x6f   : > { %913 = vmatpush1.bf16.msra.mxu0 %v912_v62  ;;  %v315_v26 = vld [vmem:[#allocation5 + $0x3c0] sm:$0xff]  ;;  %v986_v28 = vpack.c.bf16 %v318_v21, %v310_v20  ;;  %v317_v29 = vld [vmem:[#allocation5 + $0x3d0] sm:$0xff]  ;;  %v324_v30 = vld [vmem:[#allocation5 + $0x408] sm:$0xff] }
  0x70   : > { %977 = vmatpush1.bf16.msra.mxu1 %v976_v63  ;;  %915 = vmatprep.subr.bf16.mxu0 %v914_v0  ;;  %v332_v31 = vld [vmem:[#allocation5 + $0x448] sm:$0xff]  ;;  %v326_v32 = vld [vmem:[#allocation5 + $0x418] sm:$0xff]  ;;  %v924_v34 = vpack.c.bf16 %v315_v26, %v307_v25  ;;  %v988_v35 = vpack.c.bf16 %v317_v29, %v309_v27  ;;  %v323_v37 = vld [vmem:[#allocation5 + $0x400] sm:$0xff] }
  0x71   : > { %979 = vmatprep.subr.bf16.mxu1 %v978_v4  ;;  %v334_v33 = vld [vmem:[#allocation5 + $0x458] sm:$0xff]  ;;  %v926_v36 = vpack.c.bf16 %v332_v31, %v324_v30  ;;  %v331_v38 = vld [vmem:[#allocation5 + $0x440] sm:$0xff]  ;;  %v325_v39 = vld [vmem:[#allocation5 + $0x410] sm:$0xff] }
  0x72   : > { %v990_v40 = vpack.c.bf16 %v334_v33, %v326_v32  ;;  %v333_v41 = vld [vmem:[#allocation5 + $0x450] sm:$0xff]  ;;  %v340_v42 = vld [vmem:[#allocation5 + $0x488] sm:$0xff]  ;;  %v342_v44 = vld [vmem:[#allocation5 + $0x498] sm:$0xff]  ;;  %v928_v46 = vpack.c.bf16 %v331_v38, %v323_v37 }
  0x73   : > { %917 = vmatpush1.bf16.msra.mxu0 %v916_v10  ;;  %v348_v43 = vld [vmem:[#allocation5 + $0x4c8] sm:$0xff]  ;;  %v350_v45 = vld [vmem:[#allocation5 + $0x4d8] sm:$0xff]  ;;  %v992_v47 = vpack.c.bf16 %v333_v41, %v325_v39  ;;  %v339_v49 = vld [vmem:[#allocation5 + $0x480] sm:$0xff] }
  0x74   : > { %981 = vmatpush1.bf16.msra.mxu1 %v980_v11  ;;  %919 = vmatprep.subr.bf16.mxu0 %v918_v12  ;;  %v930_v48 = vpack.c.bf16 %v348_v43, %v340_v42  ;;  %v347_v50 = vld [vmem:[#allocation5 + $0x4c0] sm:$0xff]  ;;  %v341_v51 = vld [vmem:[#allocation5 + $0x490] sm:$0xff]  ;;  %v994_v52 = vpack.c.bf16 %v350_v45, %v342_v44  ;;  %v356_v54 = vld [vmem:[#allocation5 + $0x508] sm:$0xff] }
  0x75   : > { %983 = vmatprep.subr.bf16.mxu1 %v982_v16  ;;  %v349_v53 = vld [vmem:[#allocation5 + $0x4d0] sm:$0xff]  ;;  %v364_v55 = vld [vmem:[#allocation5 + $0x548] sm:$0xff]  ;;  %v358_v56 = vld [vmem:[#allocation5 + $0x518] sm:$0xff]  ;;  %v932_v58 = vpack.c.bf16 %v347_v50, %v339_v49 }
  0x76   : > { %v366_v57 = vld [vmem:[#allocation5 + $0x558] sm:$0xff]  ;;  %v996_v59 = vpack.c.bf16 %v349_v53, %v341_v51  ;;  %v934_v60 = vpack.c.bf16 %v364_v55, %v356_v54  ;;  %v355_v61 = vld [vmem:[#allocation5 + $0x500] sm:$0xff]  ;;  %v357_v63 = vld [vmem:[#allocation5 + $0x510] sm:$0xff] }
  0x77   : > { %921 = vmatpush1.bf16.msra.mxu0 %v920_v22  ;;  %v363_v62 = vld [vmem:[#allocation5 + $0x540] sm:$0xff]  ;;  %v998_v0 = vpack.c.bf16 %v366_v57, %v358_v56  ;;  %v365_v1 = vld [vmem:[#allocation5 + $0x550] sm:$0xff]  ;;  %v372_v2 = vld [vmem:[#allocation5 + $0x588] sm:$0xff] }
  0x78   : > { %985 = vmatpush1.bf16.msra.mxu1 %v984_v23  ;;  %923 = vmatprep.subr.bf16.mxu0 %v922_v24  ;;  %v380_v3 = vld [vmem:[#allocation5 + $0x5c8] sm:$0xff]  ;;  %v374_v4 = vld [vmem:[#allocation5 + $0x598] sm:$0xff]  ;;  %v936_v6 = vpack.c.bf16 %v363_v62, %v355_v61  ;;  %v371_v7 = vld [vmem:[#allocation5 + $0x580] sm:$0xff]  ;;  %v1000_v8 = vpack.c.bf16 %v365_v1, %v357_v63 }
  0x79   : > { %987 = vmatprep.subr.bf16.mxu1 %v986_v28  ;;  %v382_v5 = vld [vmem:[#allocation5 + $0x5d8] sm:$0xff]  ;;  %v938_v9 = vpack.c.bf16 %v380_v3, %v372_v2  ;;  %v379_v10 = vld [vmem:[#allocation5 + $0x5c0] sm:$0xff]  ;;  %v373_v11 = vld [vmem:[#allocation5 + $0x590] sm:$0xff] }
  0x7a   : > { %v381_v12 = vld [vmem:[#allocation5 + $0x5d0] sm:$0xff]  ;;  %v1002_v13 = vpack.c.bf16 %v382_v5, %v374_v4  ;;  %v388_v14 = vld [vmem:[#allocation5 + $0x608] sm:$0xff]  ;;  %v390_v17 = vld [vmem:[#allocation5 + $0x618] sm:$0xff]  ;;  %v940_v20 = vpack.c.bf16 %v379_v10, %v371_v7 }
  0x7b   : > { %925 = vmatpush1.bf16.msra.mxu0 %v924_v34  ;;  %v396_v15 = vld [vmem:[#allocation5 + $0x648] sm:$0xff]  ;;  %v1562_v16 = vld [vmem:[%s1551_s16] sm:$0xff]  ;;  %v1004_v21 = vpack.c.bf16 %v381_v12, %v373_v11  ;;  %v387_v23 = vld [vmem:[#allocation5 + $0x600] sm:$0xff] }
  0x7c   : > { %989 = vmatpush1.bf16.msra.mxu1 %v988_v35  ;;  %927 = vmatprep.subr.bf16.mxu0 %v926_v36  ;;  %v398_v18 = vld [vmem:[#allocation5 + $0x658] sm:$0xff]  ;;  %v1566_v19 = vcombine.high %v1562_v16, %v1562_v16  ;;  %v942_v22 = vpack.c.bf16 %v396_v15, %v388_v14  ;;  %v395_v24 = vld [vmem:[#allocation5 + $0x640] sm:$0xff]  ;;  %v389_v25 = vld [vmem:[#allocation5 + $0x610] sm:$0xff]  ;;  %194 = vst [vmem:[%s192_s19] sm:$0xff] %v1562_v16 }
  0x7d   : > { %991 = vmatprep.subr.bf16.mxu1 %v990_v40  ;;  %v1006_v26 = vpack.c.bf16 %v398_v18, %v390_v17  ;;  %v397_v27 = vld [vmem:[#allocation5 + $0x650] sm:$0xff]  ;;  %v404_v28 = vld [vmem:[#allocation5 + $0x688] sm:$0xff]  ;;  %v406_v30 = vld [vmem:[#allocation5 + $0x698] sm:$0xff]  ;;  %v944_v32 = vpack.c.bf16 %v395_v24, %v387_v23 }
  0x7e   : > { %v412_v29 = vld [vmem:[#allocation5 + $0x6c8] sm:$0xff]  ;;  %518 = vmatprep.mubr.f32.mxu0 %v1566_v19  ;;  %v414_v31 = vld [vmem:[#allocation5 + $0x6d8] sm:$0xff]  ;;  %589 = vmatprep.mubr.f32.mxu1 %v1566_v19  ;;  %v1008_v33 = vpack.c.bf16 %v397_v27, %v389_v25  ;;  %v403_v35 = vld [vmem:[#allocation5 + $0x680] sm:$0xff] }
  0x7f   : > { %929 = vmatpush1.bf16.msra.mxu0 %v928_v46  ;;  %v946_v34 = vpack.c.bf16 %v412_v29, %v404_v28  ;;  %v411_v36 = vld [vmem:[#allocation5 + $0x6c0] sm:$0xff]  ;;  %v405_v37 = vld [vmem:[#allocation5 + $0x690] sm:$0xff]  ;;  %v1010_v38 = vpack.c.bf16 %v414_v31, %v406_v30  ;;  %v420_v40 = vld [vmem:[#allocation5 + $0x708] sm:$0xff] }
  0x80   : > { %993 = vmatpush1.bf16.msra.mxu1 %v992_v47  ;;  %931 = vmatprep.subr.bf16.mxu0 %v930_v48  ;;  %v413_v39 = vld [vmem:[#allocation5 + $0x6d0] sm:$0xff]  ;;  %v428_v41 = vld [vmem:[#allocation5 + $0x748] sm:$0xff]  ;;  %v422_v42 = vld [vmem:[#allocation5 + $0x718] sm:$0xff]  ;;  %v948_v44 = vpack.c.bf16 %v411_v36, %v403_v35 }
  0x81   : > { %995 = vmatprep.subr.bf16.mxu1 %v994_v52  ;;  %v430_v43 = vld [vmem:[#allocation5 + $0x758] sm:$0xff]  ;;  %v1012_v45 = vpack.c.bf16 %v413_v39, %v405_v37  ;;  %v950_v46 = vpack.c.bf16 %v428_v41, %v420_v40  ;;  %v419_v47 = vld [vmem:[#allocation5 + $0x700] sm:$0xff]  ;;  %v421_v49 = vld [vmem:[#allocation5 + $0x710] sm:$0xff] }
  0x82   : > { %v427_v48 = vld [vmem:[#allocation5 + $0x740] sm:$0xff]  ;;  %v1014_v50 = vpack.c.bf16 %v430_v43, %v422_v42  ;;  %v429_v51 = vld [vmem:[#allocation5 + $0x750] sm:$0xff]  ;;  %v436_v52 = vld [vmem:[#allocation5 + $0x788] sm:$0xff] }
  0x83   : > { %933 = vmatpush1.bf16.msra.mxu0 %v932_v58  ;;  %v444_v53 = vld [vmem:[#allocation5 + $0x7c8] sm:$0xff]  ;;  %v438_v54 = vld [vmem:[#allocation5 + $0x798] sm:$0xff]  ;;  %v952_v56 = vpack.c.bf16 %v427_v48, %v419_v47  ;;  %v1016_v57 = vpack.c.bf16 %v429_v51, %v421_v49  ;;  %v437_v61 = vld [vmem:[#allocation5 + $0x790] sm:$0xff] }
  0x84   : > { %997 = vmatpush1.bf16.msra.mxu1 %v996_v59  ;;  %935 = vmatprep.subr.bf16.mxu0 %v934_v60  ;;  %v446_v55 = vld [vmem:[#allocation5 + $0x7d8] sm:$0xff]  ;;  %v954_v58 = vpack.c.bf16 %v444_v53, %v436_v52  ;;  %v435_v59 = vld [vmem:[#allocation5 + $0x780] sm:$0xff]  ;;  %v445_v63 = vld [vmem:[#allocation5 + $0x7d0] sm:$0xff] }
  0x85   : > { %999 = vmatprep.subr.bf16.mxu1 %v998_v0  ;;  %v443_v60 = vld [vmem:[#allocation5 + $0x7c0] sm:$0xff]  ;;  %v1018_v62 = vpack.c.bf16 %v446_v55, %v438_v54  ;;  %v200_v0 = vld [vmem:[#allocation5 + $0x28] sm:$0xff]  ;;  %v202_v2 = vld [vmem:[#allocation5 + $0x38] sm:$0xff]  ;;  %v1020_v5 = vpack.c.bf16 %v445_v63, %v437_v61 }
  0x86   : > { %v208_v1 = vld [vmem:[#allocation5 + $0x68] sm:$0xff]  ;;  %v210_v3 = vld [vmem:[#allocation5 + $0x78] sm:$0xff]  ;;  %v956_v4 = vpack.c.bf16 %v443_v60, %v435_v59  ;;  %v199_v7 = vld [vmem:[#allocation5 + $0x20] sm:$0xff] }
  0x87   : > { %937 = vmatpush1.bf16.msra.mxu0 %v936_v6  ;;  %v1022_v6 = vpack.c.bf16 %v208_v1, %v200_v0  ;;  %v1086_v10 = vpack.c.bf16 %v210_v3, %v202_v2  ;;  %v209_v11 = vld [vmem:[#allocation5 + $0x70] sm:$0xff]  ;;  %v216_v12 = vld [vmem:[#allocation5 + $0xa8] sm:$0xff]  ;;  %v218_v14 = vld [vmem:[#allocation5 + $0xb8] sm:$0xff] }
  0x88   : > { %1001 = vmatpush1.bf16.msra.mxu1 %v1000_v8  ;;  %939 = vmatprep.subr.bf16.mxu0 %v938_v9  ;;  %v207_v8 = vld [vmem:[#allocation5 + $0x60] sm:$0xff]  ;;  %v201_v9 = vld [vmem:[#allocation5 + $0x30] sm:$0xff]  ;;  %v226_v15 = vld [vmem:[#allocation5 + $0xf8] sm:$0xff] }
  0x89   : > { %1003 = vmatprep.subr.bf16.mxu1 %v1002_v13  ;;  %v224_v13 = vld [vmem:[#allocation5 + $0xe8] sm:$0xff]  ;;  %v1024_v17 = vpack.c.bf16 %v207_v8, %v199_v7  ;;  %v1088_v18 = vpack.c.bf16 %v209_v11, %v201_v9  ;;  %v217_v23 = vld [vmem:[#allocation5 + $0xb0] sm:$0xff]  ;;  %v1090_v24 = vpack.c.bf16 %v226_v15, %v218_v14  ;;  %v234_v28 = vld [vmem:[#allocation5 + $0x138] sm:$0xff] }
  0x8a   : > { %v225_v25 = vld [vmem:[#allocation5 + $0xf0] sm:$0xff]  ;;  %v240_v27 = vld [vmem:[#allocation5 + $0x168] sm:$0xff]  ;;  %v242_v29 = vld [vmem:[#allocation5 + $0x178] sm:$0xff] }
  0x8b   : > { %941 = vmatpush1.bf16.msra.mxu0 %v940_v20  ;;  %v1026_v20 = vpack.c.bf16 %v224_v13, %v216_v12  ;;  %v1092_v31 = vpack.c.bf16 %v225_v25, %v217_v23  ;;  %v233_v35 = vld [vmem:[#allocation5 + $0x130] sm:$0xff]  ;;  %v1094_v36 = vpack.c.bf16 %v242_v29, %v234_v28  ;;  %v256_v39 = vld [vmem:[#allocation5 + $0x1e8] sm:$0xff]  ;;  %v250_v40 = vld [vmem:[#allocation5 + $0x1b8] sm:$0xff] }
  0x8c   : > { %1005 = vmatpush1.bf16.msra.mxu1 %v1004_v21  ;;  %943 = vmatprep.subr.bf16.mxu0 %v942_v22  ;;  %v215_v21 = vld [vmem:[#allocation5 + $0xa0] sm:$0xff]  ;;  %v241_v37 = vld [vmem:[#allocation5 + $0x170] sm:$0xff]  ;;  %v258_v41 = vld [vmem:[#allocation5 + $0x1f8] sm:$0xff] }
  0x8d   : > { %1007 = vmatprep.subr.bf16.mxu1 %v1006_v26  ;;  %v223_v22 = vld [vmem:[#allocation5 + $0xe0] sm:$0xff]  ;;  %v232_v26 = vld [vmem:[#allocation5 + $0x128] sm:$0xff]  ;;  %v1096_v43 = vpack.c.bf16 %v241_v37, %v233_v35  ;;  %v249_v47 = vld [vmem:[#allocation5 + $0x1b0] sm:$0xff]  ;;  %v1098_v48 = vpack.c.bf16 %v258_v41, %v250_v40 }
  0x8e   : > { %v1028_v30 = vpack.c.bf16 %v223_v22, %v215_v21  ;;  %v257_v49 = vld [vmem:[#allocation5 + $0x1f0] sm:$0xff]  ;;  %v272_v51 = vld [vmem:[#allocation5 + $0x268] sm:$0xff]  ;;  %v266_v52 = vld [vmem:[#allocation5 + $0x238] sm:$0xff] }
  0x8f   : > { %945 = vmatpush1.bf16.msra.mxu0 %v944_v32  ;;  %v1030_v32 = vpack.c.bf16 %v240_v27, %v232_v26  ;;  %v274_v53 = vld [vmem:[#allocation5 + $0x278] sm:$0xff]  ;;  %v273_v60 = vld [vmem:[#allocation5 + $0x270] sm:$0xff]  ;;  %v280_v61 = vld [vmem:[#allocation5 + $0x2a8] sm:$0xff] }
  0x90   : > { %1009 = vmatpush1.bf16.msra.mxu1 %v1008_v33  ;;  %947 = vmatprep.subr.bf16.mxu0 %v946_v34  ;;  %v231_v33 = vld [vmem:[#allocation5 + $0x120] sm:$0xff]  ;;  %v1102_v59 = vpack.c.bf16 %v274_v53, %v266_v52  ;;  %v282_v63 = vld [vmem:[#allocation5 + $0x2b8] sm:$0xff]  ;;  %v289_v8 = vld [vmem:[#allocation5 + $0x2f0] sm:$0xff] }
  0x91   : > { %1011 = vmatprep.subr.bf16.mxu1 %v1010_v38  ;;  %v239_v34 = vld [vmem:[#allocation5 + $0x160] sm:$0xff]  ;;  %v248_v38 = vld [vmem:[#allocation5 + $0x1a8] sm:$0xff]  ;;  %v290_v0 = vld [vmem:[#allocation5 + $0x2f8] sm:$0xff] }
  0x92   : > { %v1032_v42 = vpack.c.bf16 %v239_v34, %v231_v33  ;;  %v1106_v7 = vpack.c.bf16 %v290_v0, %v282_v63  ;;  %v296_v9 = vld [vmem:[#allocation5 + $0x328] sm:$0xff]  ;;  %v298_v11 = vld [vmem:[#allocation5 + $0x338] sm:$0xff]  ;;  %v305_v22 = vld [vmem:[#allocation5 + $0x370] sm:$0xff] }
  0x93   : > { %949 = vmatpush1.bf16.msra.mxu0 %v948_v44  ;;  %v1034_v44 = vpack.c.bf16 %v256_v39, %v248_v38  ;;  %v306_v12 = vld [vmem:[#allocation5 + $0x378] sm:$0xff]  ;;  %v312_v23 = vld [vmem:[#allocation5 + $0x3a8] sm:$0xff]  ;;  %v321_v34 = vld [vmem:[#allocation5 + $0x3f0] sm:$0xff] }
  0x94   : > { %1013 = vmatpush1.bf16.msra.mxu1 %v1012_v45  ;;  %951 = vmatprep.subr.bf16.mxu0 %v950_v46  ;;  %v247_v45 = vld [vmem:[#allocation5 + $0x1a0] sm:$0xff]  ;;  %v1110_v21 = vpack.c.bf16 %v306_v12, %v298_v11  ;;  %v314_v25 = vld [vmem:[#allocation5 + $0x3b8] sm:$0xff]  ;;  %v328_v35 = vld [vmem:[#allocation5 + $0x428] sm:$0xff] }
  0x95   : > { %1015 = vmatprep.subr.bf16.mxu1 %v1014_v50  ;;  %v255_v46 = vld [vmem:[#allocation5 + $0x1e0] sm:$0xff]  ;;  %v264_v50 = vld [vmem:[#allocation5 + $0x228] sm:$0xff]  ;;  %v322_v26 = vld [vmem:[#allocation5 + $0x3f8] sm:$0xff] }
  0x96   : > { %v1036_v54 = vpack.c.bf16 %v255_v46, %v247_v45  ;;  %v1038_v55 = vpack.c.bf16 %v272_v51, %v264_v50  ;;  %v1114_v33 = vpack.c.bf16 %v322_v26, %v314_v25  ;;  %v330_v37 = vld [vmem:[#allocation5 + $0x438] sm:$0xff]  ;;  %v337_v46 = vld [vmem:[#allocation5 + $0x470] sm:$0xff] }
  0x97   : > { %953 = vmatpush1.bf16.msra.mxu0 %v952_v56  ;;  %v263_v56 = vld [vmem:[#allocation5 + $0x220] sm:$0xff]  ;;  %v338_v38 = vld [vmem:[#allocation5 + $0x478] sm:$0xff] }
  0x98   : > { %1017 = vmatpush1.bf16.msra.mxu1 %v1016_v57  ;;  %955 = vmatprep.subr.bf16.mxu0 %v954_v58  ;;  %v271_v57 = vld [vmem:[#allocation5 + $0x260] sm:$0xff]  ;;  %v265_v58 = vld [vmem:[#allocation5 + $0x230] sm:$0xff]  ;;  %v1118_v45 = vpack.c.bf16 %v338_v38, %v330_v37  ;;  %v354_v50 = vld [vmem:[#allocation5 + $0x4f8] sm:$0xff] }
  0x99   : > { %1019 = vmatprep.subr.bf16.mxu1 %v1018_v62  ;;  %v288_v62 = vld [vmem:[#allocation5 + $0x2e8] sm:$0xff]  ;;  %v1040_v1 = vpack.c.bf16 %v271_v57, %v263_v56  ;;  %v1104_v2 = vpack.c.bf16 %v273_v60, %v265_v58  ;;  %v353_v57 = vld [vmem:[#allocation5 + $0x4f0] sm:$0xff]  ;;  %v362_v60 = vld [vmem:[#allocation5 + $0x538] sm:$0xff] }
  0x9a   : > { %v1042_v3 = vpack.c.bf16 %v288_v62, %v280_v61  ;;  %v360_v58 = vld [vmem:[#allocation5 + $0x528] sm:$0xff]  ;;  %v370_v61 = vld [vmem:[#allocation5 + $0x578] sm:$0xff] }
  0x9b   : > { %957 = vmatpush1.bf16.msra.mxu0 %v956_v4  ;;  %v279_v4 = vld [vmem:[#allocation5 + $0x2a0] sm:$0xff] }
  0x9c   : > { %1021 = vmatpush1.bf16.msra.mxu1 %v1020_v5  ;;  %1023 = vmatprep.subr.bf16.mxu0 %v1022_v6  ;;  %v287_v5 = vld [vmem:[#allocation5 + $0x2e0] sm:$0xff]  ;;  %v281_v6 = vld [vmem:[#allocation5 + $0x2b0] sm:$0xff] }
  0x9d   : > { %1087 = vmatprep.subr.bf16.mxu1 %v1086_v10  ;;  %v304_v10 = vld [vmem:[#allocation5 + $0x368] sm:$0xff]  ;;  %v1044_v13 = vpack.c.bf16 %v287_v5, %v279_v4  ;;  %v1108_v14 = vpack.c.bf16 %v289_v8, %v281_v6  ;;  %v1126_v4 = vpack.c.bf16 %v370_v61, %v362_v60  ;;  %v369_v5 = vld [vmem:[#allocation5 + $0x570] sm:$0xff]  ;;  %v378_v8 = vld [vmem:[#allocation5 + $0x5b8] sm:$0xff] }
  0x9e   : > { %519 = vmatmul.mubr.f32.vlgmr.msra.gmra.mrb[0].mxu0 %v1562_v16  ;;  %v1046_v15 = vpack.c.bf16 %v304_v10, %v296_v9  ;;  %v376_v6 = vld [vmem:[#allocation5 + $0x5a8] sm:$0xff]  ;;  %v386_v9 = vld [vmem:[#allocation5 + $0x5f8] sm:$0xff] }
  0x9f   : > { %590 = vmatmul.mubr.f32.vlgmr.msra.gmra.mrb[0].mxu1 %v1562_v16  ;;  %1025 = vmatpush1.bf16.msra.mxu0 %v1024_v17  ;;  %v295_v17 = vld [vmem:[#allocation5 + $0x320] sm:$0xff] }
  0xa0   : > { %1089 = vmatpush1.bf16.msra.mxu1 %v1088_v18  ;;  %1027 = vmatprep.subr.bf16.mxu0 %v1026_v20  ;;  %v303_v18 = vld [vmem:[#allocation5 + $0x360] sm:$0xff]  ;;  %v297_v20 = vld [vmem:[#allocation5 + $0x330] sm:$0xff] }
  0xa1   : > { %1091 = vmatprep.subr.bf16.mxu1 %v1090_v24  ;;  %660 = vmatprep.mubr.f32.mxu0 %v1566_v19  ;;  %v320_v24 = vld [vmem:[#allocation5 + $0x3e8] sm:$0xff]  ;;  %v1048_v27 = vpack.c.bf16 %v303_v18, %v295_v17  ;;  %v1112_v28 = vpack.c.bf16 %v305_v22, %v297_v20  ;;  %v1130_v17 = vpack.c.bf16 %v386_v9, %v378_v8  ;;  %v385_v18 = vld [vmem:[#allocation5 + $0x5f0] sm:$0xff]  ;;  %v394_v22 = vld [vmem:[#allocation5 + $0x638] sm:$0xff] }
  0xa2   : > { %731 = vmatprep.mubr.f32.mxu1 %v1566_v19  ;;  %v1100_v19 = vpack.c.bf16 %v257_v49, %v249_v47  ;;  %v1050_v29 = vpack.c.bf16 %v320_v24, %v312_v23  ;;  %v344_v47 = vld [vmem:[#allocation5 + $0x4a8] sm:$0xff]  ;;  %v346_v49 = vld [vmem:[#allocation5 + $0x4b8] sm:$0xff] }
  0xa3   : > { %1029 = vmatpush1.bf16.msra.mxu0 %v1028_v30  ;;  %v311_v30 = vld [vmem:[#allocation5 + $0x3a0] sm:$0xff]  ;;  %v1122_v56 = vpack.c.bf16 %v354_v50, %v346_v49  ;;  %v392_v20 = vld [vmem:[#allocation5 + $0x628] sm:$0xff]  ;;  %v402_v23 = vld [vmem:[#allocation5 + $0x678] sm:$0xff] }
  0xa4   : > { %1093 = vmatpush1.bf16.msra.mxu1 %v1092_v31  ;;  %1031 = vmatprep.subr.bf16.mxu0 %v1030_v32  ;;  %v319_v31 = vld [vmem:[#allocation5 + $0x3e0] sm:$0xff]  ;;  %v313_v32 = vld [vmem:[#allocation5 + $0x3b0] sm:$0xff] }
  0xa5   : > { %1095 = vmatprep.subr.bf16.mxu1 %v1094_v36  ;;  %v336_v36 = vld [vmem:[#allocation5 + $0x468] sm:$0xff]  ;;  %v1052_v39 = vpack.c.bf16 %v319_v31, %v311_v30  ;;  %v1116_v40 = vpack.c.bf16 %v321_v34, %v313_v32  ;;  %v1134_v30 = vpack.c.bf16 %v402_v23, %v394_v22  ;;  %v401_v31 = vld [vmem:[#allocation5 + $0x670] sm:$0xff]  ;;  %v410_v34 = vld [vmem:[#allocation5 + $0x6b8] sm:$0xff] }
  0xa6   : > { %v1054_v41 = vpack.c.bf16 %v336_v36, %v328_v35  ;;  %v408_v32 = vld [vmem:[#allocation5 + $0x6a8] sm:$0xff]  ;;  %v418_v35 = vld [vmem:[#allocation5 + $0x6f8] sm:$0xff] }
  0xa7   : > { %1033 = vmatpush1.bf16.msra.mxu0 %v1032_v42  ;;  %v327_v42 = vld [vmem:[#allocation5 + $0x420] sm:$0xff] }
  0xa8   : > { %1097 = vmatpush1.bf16.msra.mxu1 %v1096_v43  ;;  %1035 = vmatprep.subr.bf16.mxu0 %v1034_v44  ;;  %v335_v43 = vld [vmem:[#allocation5 + $0x460] sm:$0xff]  ;;  %v329_v44 = vld [vmem:[#allocation5 + $0x430] sm:$0xff] }
  0xa9   : > { %1099 = vmatprep.subr.bf16.mxu1 %v1098_v48  ;;  %v352_v48 = vld [vmem:[#allocation5 + $0x4e8] sm:$0xff]  ;;  %v1056_v51 = vpack.c.bf16 %v335_v43, %v327_v42  ;;  %v1120_v52 = vpack.c.bf16 %v337_v46, %v329_v44  ;;  %v1138_v42 = vpack.c.bf16 %v418_v35, %v410_v34  ;;  %v417_v43 = vld [vmem:[#allocation5 + $0x6f0] sm:$0xff]  ;;  %v426_v46 = vld [vmem:[#allocation5 + $0x738] sm:$0xff] }
  0xaa   : > { %v1058_v53 = vpack.c.bf16 %v352_v48, %v344_v47  ;;  %v424_v44 = vld [vmem:[#allocation5 + $0x728] sm:$0xff]  ;;  %v434_v47 = vld [vmem:[#allocation5 + $0x778] sm:$0xff] }
  0xab   : > { %1037 = vmatpush1.bf16.msra.mxu0 %v1036_v54  ;;  %v343_v54 = vld [vmem:[#allocation5 + $0x4a0] sm:$0xff] }
  0xac   : > { %1101 = vmatpush1.bf16.msra.mxu1 %v1100_v19  ;;  %1039 = vmatprep.subr.bf16.mxu0 %v1038_v55  ;;  %v351_v19 = vld [vmem:[#allocation5 + $0x4e0] sm:$0xff]  ;;  %v345_v55 = vld [vmem:[#allocation5 + $0x4b0] sm:$0xff] }
  0xad   : > { %1103 = vmatprep.subr.bf16.mxu1 %v1102_v59  ;;  %v368_v59 = vld [vmem:[#allocation5 + $0x568] sm:$0xff]  ;;  %v1060_v62 = vpack.c.bf16 %v351_v19, %v343_v54  ;;  %v1124_v63 = vpack.c.bf16 %v353_v57, %v345_v55  ;;  %v1142_v54 = vpack.c.bf16 %v434_v47, %v426_v46  ;;  %v433_v19 = vld [vmem:[#allocation5 + $0x770] sm:$0xff]  ;;  %v442_v57 = vld [vmem:[#allocation5 + $0x7b8] sm:$0xff] }
  0xae   : > { %v1062_v0 = vpack.c.bf16 %v368_v59, %v360_v58  ;;  %v440_v55 = vld [vmem:[#allocation5 + $0x7a8] sm:$0xff]  ;;  %v450_v58 = vld [vmem:[#allocation5 + $0x7f8] sm:$0xff] }
  0xaf   : > { %1041 = vmatpush1.bf16.msra.mxu0 %v1040_v1  ;;  %v359_v1 = vld [vmem:[#allocation5 + $0x520] sm:$0xff] }
  0xb0   : > { %1105 = vmatpush1.bf16.msra.mxu1 %v1104_v2  ;;  %1043 = vmatprep.subr.bf16.mxu0 %v1042_v3  ;;  %v367_v2 = vld [vmem:[#allocation5 + $0x560] sm:$0xff]  ;;  %v361_v3 = vld [vmem:[#allocation5 + $0x530] sm:$0xff] }
  0xb1   : > { %1107 = vmatprep.subr.bf16.mxu1 %v1106_v7  ;;  %v384_v7 = vld [vmem:[#allocation5 + $0x5e8] sm:$0xff]  ;;  %v1064_v10 = vpack.c.bf16 %v367_v2, %v359_v1  ;;  %v1128_v11 = vpack.c.bf16 %v369_v5, %v361_v3  ;;  %v441_v1 = vld [vmem:[#allocation5 + $0x7b0] sm:$0xff] }
  0xb2   : > { %v1066_v12 = vpack.c.bf16 %v384_v7, %v376_v6  ;;  %v449_v2 = vld [vmem:[#allocation5 + $0x7f0] sm:$0xff] }
  0xb3   : > { %1045 = vmatpush1.bf16.msra.mxu0 %v1044_v13  ;;  %v375_v13 = vld [vmem:[#allocation5 + $0x5a0] sm:$0xff] }
  0xb4   : > { %1109 = vmatpush1.bf16.msra.mxu1 %v1108_v14  ;;  %1047 = vmatprep.subr.bf16.mxu0 %v1046_v15  ;;  %v383_v14 = vld [vmem:[#allocation5 + $0x5e0] sm:$0xff]  ;;  %v377_v15 = vld [vmem:[#allocation5 + $0x5b0] sm:$0xff] }
  0xb5   : > { %1111 = vmatprep.subr.bf16.mxu1 %v1110_v21  ;;  %v400_v21 = vld [vmem:[#allocation5 + $0x668] sm:$0xff]  ;;  %v1068_v24 = vpack.c.bf16 %v383_v14, %v375_v13  ;;  %v1132_v25 = vpack.c.bf16 %v385_v18, %v377_v15 }
  0xb6   : > { %v1070_v26 = vpack.c.bf16 %v400_v21, %v392_v20 }
  0xb7   : > { %1049 = vmatpush1.bf16.msra.mxu0 %v1048_v27  ;;  %v391_v27 = vld [vmem:[#allocation5 + $0x620] sm:$0xff] }
  0xb8   : > { %1113 = vmatpush1.bf16.msra.mxu1 %v1112_v28  ;;  %1051 = vmatprep.subr.bf16.mxu0 %v1050_v29  ;;  %v399_v28 = vld [vmem:[#allocation5 + $0x660] sm:$0xff]  ;;  %v393_v29 = vld [vmem:[#allocation5 + $0x630] sm:$0xff] }
  0xb9   : > { %1115 = vmatprep.subr.bf16.mxu1 %v1114_v33  ;;  %v416_v33 = vld [vmem:[#allocation5 + $0x6e8] sm:$0xff]  ;;  %v1072_v36 = vpack.c.bf16 %v399_v28, %v391_v27  ;;  %v1136_v37 = vpack.c.bf16 %v401_v31, %v393_v29 }
  0xba   : > { %v1074_v38 = vpack.c.bf16 %v416_v33, %v408_v32 }
  0xbb   : > { %1053 = vmatpush1.bf16.msra.mxu0 %v1052_v39  ;;  %v407_v39 = vld [vmem:[#allocation5 + $0x6a0] sm:$0xff] }
  0xbc   : > { %1117 = vmatpush1.bf16.msra.mxu1 %v1116_v40  ;;  %1055 = vmatprep.subr.bf16.mxu0 %v1054_v41  ;;  %v415_v40 = vld [vmem:[#allocation5 + $0x6e0] sm:$0xff]  ;;  %v409_v41 = vld [vmem:[#allocation5 + $0x6b0] sm:$0xff] }
  0xbd   : > { %1119 = vmatprep.subr.bf16.mxu1 %v1118_v45  ;;  %v432_v45 = vld [vmem:[#allocation5 + $0x768] sm:$0xff]  ;;  %v1076_v48 = vpack.c.bf16 %v415_v40, %v407_v39  ;;  %v1140_v49 = vpack.c.bf16 %v417_v43, %v409_v41 }
  0xbe   : > { %v1078_v50 = vpack.c.bf16 %v432_v45, %v424_v44 }
  0xbf   : > { %1057 = vmatpush1.bf16.msra.mxu0 %v1056_v51  ;;  %v423_v51 = vld [vmem:[#allocation5 + $0x720] sm:$0xff] }
  0xc0   : > { %1121 = vmatpush1.bf16.msra.mxu1 %v1120_v52  ;;  %1059 = vmatprep.subr.bf16.mxu0 %v1058_v53  ;;  %v431_v52 = vld [vmem:[#allocation5 + $0x760] sm:$0xff]  ;;  %v425_v53 = vld [vmem:[#allocation5 + $0x730] sm:$0xff] }
  0xc1   : > { %1123 = vmatprep.subr.bf16.mxu1 %v1122_v56  ;;  %v448_v56 = vld [vmem:[#allocation5 + $0x7e8] sm:$0xff]  ;;  %v1080_v59 = vpack.c.bf16 %v431_v52, %v423_v51  ;;  %v1144_v60 = vpack.c.bf16 %v433_v19, %v425_v53 }
  0xc2   : > { %v1082_v61 = vpack.c.bf16 %v448_v56, %v440_v55 }
  0xc3   : > { %1061 = vmatpush1.bf16.msra.mxu0 %v1060_v62  ;;  %v439_v62 = vld [vmem:[#allocation5 + $0x7a0] sm:$0xff] }
  0xc4   : > { %1125 = vmatpush1.bf16.msra.mxu1 %v1124_v63  ;;  %1063 = vmatprep.subr.bf16.mxu0 %v1062_v0  ;;  %v447_v63 = vld [vmem:[#allocation5 + $0x7e0] sm:$0xff]  ;;  %v1146_v0 = vpack.c.bf16 %v450_v58, %v442_v57 }
  0xc5   : > { %1127 = vmatprep.subr.bf16.mxu1 %v1126_v4  ;;  %v1084_v3 = vpack.c.bf16 %v447_v63, %v439_v62  ;;  %v1148_v4 = vpack.c.bf16 %v449_v2, %v441_v1 }
  0xc7   : > { %1065 = vmatpush1.bf16.msra.mxu0 %v1064_v10 }
  0xc8   : > { %1129 = vmatpush1.bf16.msra.mxu1 %v1128_v11  ;;  %1067 = vmatprep.subr.bf16.mxu0 %v1066_v12 }
  0xc9   : > { %1131 = vmatprep.subr.bf16.mxu1 %v1130_v17 }
  0xcb   : > { %1069 = vmatpush1.bf16.msra.mxu0 %v1068_v24 }
  0xcc   : > { %1133 = vmatpush1.bf16.msra.mxu1 %v1132_v25  ;;  %1071 = vmatprep.subr.bf16.mxu0 %v1070_v26 }
  0xcd   : > { %1135 = vmatprep.subr.bf16.mxu1 %v1134_v30 }
  0xcf   : > { %1073 = vmatpush1.bf16.msra.mxu0 %v1072_v36 }
  0xd0   : > { %1137 = vmatpush1.bf16.msra.mxu1 %v1136_v37  ;;  %1075 = vmatprep.subr.bf16.mxu0 %v1074_v38 }
  0xd1   : > { %1139 = vmatprep.subr.bf16.mxu1 %v1138_v42 }
  0xd3   : > { %1077 = vmatpush1.bf16.msra.mxu0 %v1076_v48 }
  0xd4   : > { %1141 = vmatpush1.bf16.msra.mxu1 %v1140_v49  ;;  %1079 = vmatprep.subr.bf16.mxu0 %v1078_v50 }
  0xd5   : > { %1143 = vmatprep.subr.bf16.mxu1 %v1142_v54 }
  0xd7   : > { %1081 = vmatpush1.bf16.msra.mxu0 %v1080_v59 }
  0xd8   : > { %1145 = vmatpush1.bf16.msra.mxu1 %v1144_v60  ;;  %1083 = vmatprep.subr.bf16.mxu0 %v1082_v61 }
  0xd9   : > { %1147 = vmatprep.subr.bf16.mxu1 %v1146_v0 }
  0xdb   : > { %1085 = vmatpush1.bf16.msra.mxu0 %v1084_v3 }
  0xdc   : > { %1149 = vmatpush1.bf16.msra.mxu1 %v1148_v4 }
  0xde   : > { %661 = vmatmul.mubr.f32.vlgmr.msra.gmra.mrb[2].mxu0 %v1562_v16 }
  0xdf   : > { %732 = vmatmul.mubr.f32.vlgmr.msra.gmra.mrb[2].mxu1 %v1562_v16 }
 0x171   : > { %v520_v5 = vpop.f32.mrb[0].mxu0 }
 0x172   : > { %v591_v6 = vpop.f32.mrb[0].mxu1  ;;  %v522_v7 = vpop.f32.mrb[1].mxu0 }
 0x173   : > { %v740_v8 = vcombine.low %v520_v5, %v522_v7  ;;  %v593_v9 = vpop.f32.mrb[1].mxu1 }
 0x174   : > { %v746_v10 = vcombine.low %v591_v6, %v593_v9 }
 0x175   : > { %886 = vst [vmem:[%s192_s19 + $0x8] sm:$0xff] %v740_v8 }
 0x176   : > { %887 = vst [vmem:[%s192_s19 + $0x10] sm:$0xff] %v746_v10 }
 0x1b1   : > { %v662_v11 = vpop.f32.mrb[2].mxu0 }
 0x1b2   : > { %v733_v12 = vpop.f32.mrb[2].mxu1  ;;  %v664_v13 = vpop.f32.mrb[3].mxu0 }
 0x1b3   : > { %v752_v16 = vcombine.low %v662_v11, %v664_v13  ;;  %v735_v14 = vpop.f32.mrb[3].mxu1 }
 0x1b4   : > { %v758_v15 = vcombine.low %v733_v12, %v735_v14 }
 0x1b5   : > { %888 = vst [vmem:[%s192_s19 + $0x18] sm:$0xff] %v752_v16 }
 0x1b6   : > { %889 = vst [vmem:[%s192_s19 + $0x20] sm:$0xff] %v758_v15 }
 0x1b7   : > { %1301 = shalt.err (!%p1298_p5)
}
 0x1b8   : > { %s1302_s29 = scalar_lea.hbm %s1584_s7, 640  ;;  %s1306_s8 = scalar_lea.hbm %s1635_s2, 1280 }
 0x1b9   : > { %p1303_p9 = scmp.ne.s32.totalorder %s1584_s7, %s1302_s29  ;;  %p1307_p7 = scmp.lt.u32.totalorder %s1584_s7, %s1635_s2 }
 0x1ba   : > { %p1308_p3 = scmp.lt.u32.totalorder %s1306_s8, %s1302_s29  ;;  %p1310_p4 = scmp.lt.u32.totalorder %s1302_s29, %s1584_s7 }
 0x1bb   : > { %p1304_p1 = pnand %p1303_p9, %p1494_p10 }
 0x1bc   : > { %p1309_p13 = por %p1308_p3, %p1307_p7 }
 0x1bd   : > { %p1305_p2 = pneg %p1304_p1 }
 0x1be   : > { %p1311_p6 = por %p1310_p4, %p1309_p13 }
 0x1c0   : > { %p1312_p8 = pnand %p1311_p6, %p1305_p2 }
 0x1c2   : > { %1315 = shalt.err (!%p1312_p8)
}
 0x1c3   : > { %s1381_s17 = smov 128   ;;  %s1382_s19 = smov 8  }
 0x1c4   : > { %1158 = dma.vmem_to_hbm [thread:$0]  (%p1494_p10), %s1579_s21, 640, %s1584_s7, %s763_s24, %s1381_s17, %s1381_s17, %s1382_s19  }
 0x1c5 PF: > { %s793_s4 = sand.u32 1, %s1354_s9   ;;  %p1653_p12 = scmp.ne.s32.totalorder %s1643_s20, 0 }
 0x1c6   : > { %p1654_p11 = scmp.ge.s32.totalorder %s1374_s14, 2  ;;  %s794_s5 = scalar_lea.sflag [#allocation4], %s793_s4 }
 0x1c8   : > { %p1169_p0 = pnand %p1654_p11, %p1653_p12 }
 0x1ca   : > { %1349 = dma.done.wait (!%p1169_p0), %s794_s5, 640  }
 0x1cb   : > { %1351 = vsyncadd (!%p1169_p0), %s794_s5, 4294966656  ;;  %s19_s14 = sadd.s32 1, %s1374_s14   ;;  %s1655_s9 = smov %s1358_s10 }
 0x1cc   : > { %p16_p5 = scmp.ge.s32.totalorder %s19_s14, 4   ;;  %s1656_s10 = smov %s1362_s11 }
 0x1cd   : > { %s1657_s11 = smov %s1503_s28  ;;  %s1658_s12 = smov %s1370_s13 }
 0x1ce   : > { %s1659_s13 = smov %s1661_s25  ;;  %18 = sbr.rel (!%p16_p5) target bundleno = 7 (0x7), region = 81 }
 0x1d5   :  { %799 = vsyncpa [#allocation3], 1 }
 0x1d6   :  { %801 = vsyncpa [#allocation3 + $0x1], 1 }
 0x1d7   :  { %802 = vsyncpa [#allocation6], 1 }
 0x1d8   :  { %803 = vsyncpa [#allocation4], 1 }
 0x1d9   :  { %805 = vsyncpa [#allocation4 + $0x1], 1 }

</bundles_post_ra>
